<compile_context>
chip_gen: v5e
topology: v5e:2x2
jax: 0.10.0
libtpu: 0.0.40
codegen_flags: <defaults>
</compile_context>

<pallas_src>
import functools
import numpy as np
import jax
import jax.numpy as jnp
from jax import lax
from jax.experimental import pallas as pl
from jax.experimental.pallas import tpu as pltpu

N_PAD = 128  # node axis padded to one full lane width


def _simplenet_kernel(adjt_ref, xt_ref, w1t_ref, wh_ref, bias_ref, mrow_ref,
                      out_ref, *, n_real):
    np_lanes = adjt_ref.shape[0]                      # 128
    adjt = adjt_ref[...]                              # [NP, NP] bf16  (= adj^T, zero-padded)

    # --- GCN layer 1:  h^T = relu(w1^T @ (x^T @ adj^T) + b1)  == relu((adj @ x) @ w1 + b1)^T
    xa = jnp.dot(xt_ref[...], adjt,
                 preferred_element_type=jnp.float32)                       # [F, NP] f32
    pre = jnp.dot(w1t_ref[...], xa.astype(jnp.bfloat16),
                  preferred_element_type=jnp.float32)                      # [H, NP] f32
    b1c = bias_ref[:, 0:1]                                                 # [H, 1]  f32
    h_t = jnp.maximum(pre + b1c, 0.0)                                      # ReLU in f32

    # zero out padded node columns (keeps node-max exact; GCN is unaffected either way)
    lane = lax.broadcasted_iota(jnp.int32, (1, np_lanes), 1)               # [1, NP]
    h_t = h_t * (lane < n_real).astype(jnp.float32)

    # --- GCN layer 2 (pre-head):  g = (adj @ h)^T
    h_bf = h_t.astype(jnp.bfloat16)
    g = jnp.dot(h_bf, adjt, preferred_element_type=jnp.float32)            # [H, NP] f32

    # --- packed heads: rows of wh are [w2^T ; wv^T ; wd^T ; 0...]
    wh = wh_ref[...]                                                       # [8, H] bf16
    head_g = jnp.dot(wh, g.astype(jnp.bfloat16),
                     preferred_element_type=jnp.float32)                   # [8, NP]
    node_logits = head_g[0:1, :]                                           # [1, NP] (b2 added via mask row)

    # torch.max(x, dim=0)[0]  (node-wise max of h)  -> [H, 1]
    x_max = jnp.max(h_t, axis=1, keepdims=True)                            # f32
    head_m = jnp.dot(wh, x_max.astype(jnp.bfloat16),
                     preferred_element_type=jnp.float32)                   # [8, 1]
    v = head_m[1:2, 0:1] + bias_ref[0:1, 1:2]                              # value head + bv
    pn = head_m[2:3, 0:1]                                                  # do-nothing head (bd via mask row)

    # --- masked softmax over one lane-dense [1,128] row:
    #   lanes 0..N-1 : node logits (+b2 if ready, else -1e30), lane N : pn (+bd), rest : -1e30
    logits = jnp.where(lane == n_real, pn, node_logits) + mrow_ref[...]    # [1, NP] f32
    m = jnp.max(logits, axis=1, keepdims=True)
    e = jnp.exp(logits - m)                                                # masked lanes -> exactly 0
    denom = jnp.sum(e, axis=1, keepdims=True)
    r = pl.reciprocal(denom, approx=True)
    r = r * (2.0 - denom * r)                                              # one Newton step
    probs = e * r

    out_ref[0:1, :] = probs
    out_ref[1:2, :] = jnp.broadcast_to(v, (1, np_lanes))


def simplenet_forward(adj_t, x_t, w1_t, w_heads, bias_pack, mask_bias_row, n_real):
    np_lanes = adj_t.shape[0]
    vmem = pl.BlockSpec(memory_space=pltpu.MemorySpace.VMEM)
    kernel = functools.partial(_simplenet_kernel, n_real=n_real)
    return pl.pallas_call(
        kernel,
        out_shape=jax.ShapeDtypeStruct((2, np_lanes), jnp.float32),
        in_specs=[vmem] * 6,
        out_specs=vmem,
    )(adj_t, x_t, w1_t, w_heads, bias_pack, mask_bias_row)


def build_normalized_adjacency(edge_index, num_nodes):
    # flow='target_to_source': aggregate over outgoing edges; deg = out-degree + self loop.
    A = np.zeros((num_nodes, num_nodes), dtype=np.float32)
    src, dst = edge_index
    A[src, dst] = 1.0
    A_sl = A + np.eye(num_nodes, dtype=np.float32)
    deg = A_sl.sum(axis=1)
    d_inv_sqrt = np.where(deg > 0, 1.0 / np.sqrt(deg), 0.0).astype(np.float32)
    return (d_inv_sqrt[:, None] * A_sl) * d_inv_sqrt[None, :]


if __name__ == "__main__":
    N, F_IN, HID = 8, 16, 64

    key = jax.random.PRNGKey(0)
    k_x, k_w1, k_w2, k_wv, k_wd = jax.random.split(key, 5)

    x = jax.random.normal(k_x, (N, F_IN), dtype=jnp.float32)
    edge_index = np.array(
        [[0, 1, 2, 3, 4, 5, 6, 0, 2, 1],
         [1, 2, 3, 4, 5, 6, 7, 3, 5, 7]], dtype=np.int32)
    ready = np.array([1, 0, 1, 1, 0, 1, 0, 1], dtype=np.int32).reshape(N, 1)

    params = {
        "w1": 0.1 * jax.random.normal(k_w1, (F_IN, HID), dtype=jnp.float32),
        "b1": jnp.zeros((1, HID), dtype=jnp.float32),
        "w2": 0.1 * jax.random.normal(k_w2, (HID, 1), dtype=jnp.float32),
        "b2": 0.01,
        "wv": 0.1 * jax.random.normal(k_wv, (HID, 1), dtype=jnp.float32),
        "bv": -0.02,
        "wd": 0.1 * jax.random.normal(k_wd, (HID, 1), dtype=jnp.float32),
        "bd": 0.03,
    }

    # ---- host-side packing (feature-major layout, nodes padded to 128 lanes) ----
    adj_small = build_normalized_adjacency(edge_index, N)          # [N, N]

    adj_t = np.zeros((N_PAD, N_PAD), dtype=np.float32)
    adj_t[:N, :N] = adj_small.T

    x_t = np.zeros((F_IN, N_PAD), dtype=np.float32)
    x_t[:, :N] = np.asarray(x).T

    w1_t = np.asarray(params["w1"]).T                                # [HID, F_IN]

    w_heads = np.zeros((8, HID), dtype=np.float32)                   # rows: w2 | wv | wd | 0...
    w_heads[0] = np.asarray(params["w2"])[:, 0]
    w_heads[1] = np.asarray(params["wv"])[:, 0]
    w_heads[2] = np.asarray(params["wd"])[:, 0]

    bias_pack = np.zeros((HID, 2), dtype=np.float32)                 # col0 = b1, [0,1] = bv
    bias_pack[:, 0] = np.asarray(params["b1"])[0]
    bias_pack[0, 1] = params["bv"]

    mask_bias_row = np.full((1, N_PAD), -1e30, dtype=np.float32)     # additive mask (+b2 / +bd folded in)
    mask_bias_row[0, :N] = np.where(ready[:, 0] == 1, params["b2"], -1e30)
    mask_bias_row[0, N] = params["bd"]

    # bf16 matmul operands, f32 for bias/mask (elementwise math stays f32 in-kernel)
    adj_t_d = jnp.asarray(adj_t, dtype=jnp.bfloat16)
    x_t_d = jnp.asarray(x_t, dtype=jnp.bfloat16)
    w1_t_d = jnp.asarray(w1_t, dtype=jnp.bfloat16)
    w_heads_d = jnp.asarray(w_heads, dtype=jnp.bfloat16)
    bias_pack_d = jnp.asarray(bias_pack, dtype=jnp.float32)
    mask_row_d = jnp.asarray(mask_bias_row, dtype=jnp.float32)

    out = simplenet_forward(adj_t_d, x_t_d, w1_t_d, w_heads_d,
                            bias_pack_d, mask_row_d, n_real=N)
    out = jax.block_until_ready(out)
    out_np = np.asarray(out)

    probs_full = out_np[0, :N + 1]     # lanes 0..N-1 = node probs (0 where not ready), lane N = do-nothing
    value = out_np[1, 0:1]             # value head, shape (1,)

    # Host-side gather of the ready entries (matches torch boolean indexing + cat + softmax;
    # identical values because non-ready lanes received exactly zero probability mass).
    ready_idx = np.where(ready[:, 0] == 1)[0]
    probs = np.concatenate([probs_full[ready_idx], probs_full[N:N + 1]], axis=0)

    assert probs.shape == (len(ready_idx) + 1,)
    assert np.all(np.isfinite(probs)) and np.all(probs >= 0.0)
    assert np.isclose(probs.sum(), 1.0, atol=1e-4)
    assert value.shape == (1,) and np.isfinite(value[0])
    print("KERNEL_OK")
</pallas_src>

<mosaic_0001>
module attributes {stable_mosaic.version = 11 : i64} {
  func.func @_simplenet_kernel(%arg0: memref<128x128xbf16, #tpu.memory_space<vmem>>, %arg1: memref<16x128xbf16, #tpu.memory_space<vmem>>, %arg2: memref<64x16xbf16, #tpu.memory_space<vmem>>, %arg3: memref<8x64xbf16, #tpu.memory_space<vmem>>, %arg4: memref<64x2xf32, #tpu.memory_space<vmem>>, %arg5: memref<1x128xf32, #tpu.memory_space<vmem>>, %arg6: memref<2x128xf32, #tpu.memory_space<vmem>>) attributes {dimension_semantics = [], scalar_prefetch = 0 : i64, scratch_operands = 0 : i64, tpu.core_type = #tpu.core_type<tc>} {
    %c0 = arith.constant 0 : index
    %c0_0 = arith.constant 0 : index
    %0 = vector.load %arg0[%c0, %c0_0] : memref<128x128xbf16, #tpu.memory_space<vmem>>, vector<128x128xbf16>
    %c0_1 = arith.constant 0 : index
    %c0_2 = arith.constant 0 : index
    %1 = vector.load %arg1[%c0_1, %c0_2] : memref<16x128xbf16, #tpu.memory_space<vmem>>, vector<16x128xbf16>
    %cst = arith.constant dense<0.000000e+00> : vector<16x128xf32>
    %2 = tpu.matmul %1, %0, %cst {dimension_numbers = #tpu.dot_dimension_numbers<[1], [0], [0], [1], [0, 0, 1, 1], [], []>} : vector<16x128xbf16>, vector<128x128xbf16>, vector<16x128xf32> -> vector<16x128xf32>
    %c0_3 = arith.constant 0 : index
    %c0_4 = arith.constant 0 : index
    %3 = vector.load %arg2[%c0_3, %c0_4] : memref<64x16xbf16, #tpu.memory_space<vmem>>, vector<64x16xbf16>
    %4 = arith.truncf %2 : vector<16x128xf32> to vector<16x128xbf16>
    %cst_5 = arith.constant dense<0.000000e+00> : vector<64x128xf32>
    %5 = tpu.matmul %3, %4, %cst_5 {dimension_numbers = #tpu.dot_dimension_numbers<[1], [0], [0], [1], [0, 0, 1, 1], [], []>} : vector<64x16xbf16>, vector<16x128xbf16>, vector<64x128xf32> -> vector<64x128xf32>
    %c0_6 = arith.constant 0 : index
    %c0_7 = arith.constant 0 : index
    %6 = vector.load %arg4[%c0_6, %c0_7] : memref<64x2xf32, #tpu.memory_space<vmem>>, vector<64x1xf32>
    %7 = vector.broadcast %6 : vector<64x1xf32> to vector<64x128xf32>
    %8 = arith.addf %5, %7 : vector<64x128xf32>
    %cst_8 = arith.constant 0.000000e+00 : f32
    %9 = vector.broadcast %cst_8 : f32 to vector<64x128xf32>
    %10 = arith.maximumf %8, %9 : vector<64x128xf32>
    %11 = tpu.iota {dimensions = array<i32: 1>} : vector<1x128xi32>
    %c8_i32 = arith.constant 8 : i32
    %12 = vector.broadcast %c8_i32 : i32 to vector<1x128xi32>
    %13 = arith.cmpi slt, %11, %12 : vector<1x128xi32>
    %14 = arith.extui %13 : vector<1x128xi1> to vector<1x128xi32>
    %15 = arith.sitofp %14 : vector<1x128xi32> to vector<1x128xf32>
    %16 = vector.broadcast %15 : vector<1x128xf32> to vector<64x128xf32>
    %17 = arith.mulf %10, %16 : vector<64x128xf32>
    %18 = arith.truncf %17 : vector<64x128xf32> to vector<64x128xbf16>
    %cst_9 = arith.constant dense<0.000000e+00> : vector<64x128xf32>
    %19 = tpu.matmul %18, %0, %cst_9 {dimension_numbers = #tpu.dot_dimension_numbers<[1], [0], [0], [1], [0, 0, 1, 1], [], []>} : vector<64x128xbf16>, vector<128x128xbf16>, vector<64x128xf32> -> vector<64x128xf32>
    %c0_10 = arith.constant 0 : index
    %c0_11 = arith.constant 0 : index
    %20 = vector.load %arg3[%c0_10, %c0_11] : memref<8x64xbf16, #tpu.memory_space<vmem>>, vector<8x64xbf16>
    %21 = arith.truncf %19 : vector<64x128xf32> to vector<64x128xbf16>
    %cst_12 = arith.constant dense<0.000000e+00> : vector<8x128xf32>
    %22 = tpu.matmul %20, %21, %cst_12 {dimension_numbers = #tpu.dot_dimension_numbers<[1], [0], [0], [1], [0, 0, 1, 1], [], []>} : vector<8x64xbf16>, vector<64x128xbf16>, vector<8x128xf32> -> vector<8x128xf32>
    %23 = vector.extract_strided_slice %22 {offsets = [0, 0], sizes = [1, 128], strides = [1, 1]} : vector<8x128xf32> to vector<1x128xf32>
    %cst_13 = arith.constant dense<0xFF800000> : vector<64xf32>
    %24 = vector.multi_reduction <maximumf>, %17, %cst_13 [1] : vector<64x128xf32> to vector<64xf32>
    %25 = vector.shape_cast %24 : vector<64xf32> to vector<64x1xf32>
    %26 = arith.truncf %25 : vector<64x1xf32> to vector<64x1xbf16>
    %cst_14 = arith.constant dense<0.000000e+00> : vector<8x1xf32>
    %27 = tpu.matmul %20, %26, %cst_14 {dimension_numbers = #tpu.dot_dimension_numbers<[1], [0], [0], [1], [0, 0, 1, 1], [], []>} : vector<8x64xbf16>, vector<64x1xbf16>, vector<8x1xf32> -> vector<8x1xf32>
    %28 = vector.extract_strided_slice %27 {offsets = [1, 0], sizes = [1, 1], strides = [1, 1]} : vector<8x1xf32> to vector<1x1xf32>
    %c0_15 = arith.constant 0 : index
    %c1 = arith.constant 1 : index
    %29 = vector.load %arg4[%c0_15, %c1] : memref<64x2xf32, #tpu.memory_space<vmem>>, vector<1x1xf32>
    %30 = arith.addf %28, %29 : vector<1x1xf32>
    %31 = vector.extract_strided_slice %27 {offsets = [2, 0], sizes = [1, 1], strides = [1, 1]} : vector<8x1xf32> to vector<1x1xf32>
    %c8_i32_16 = arith.constant 8 : i32
    %32 = vector.broadcast %c8_i32_16 : i32 to vector<1x128xi32>
    %33 = arith.cmpi eq, %11, %32 : vector<1x128xi32>
    %34 = vector.shape_cast %31 : vector<1x1xf32> to vector<1x1xf32>
    %35 = vector.broadcast %34 : vector<1x1xf32> to vector<1x128xf32>
    %36 = arith.select %33, %35, %23 : vector<1x128xi1>, vector<1x128xf32>
    %c0_17 = arith.constant 0 : index
    %c0_18 = arith.constant 0 : index
    %37 = vector.load %arg5[%c0_17, %c0_18] : memref<1x128xf32, #tpu.memory_space<vmem>>, vector<1x128xf32>
    %38 = arith.addf %36, %37 : vector<1x128xf32>
    %cst_19 = arith.constant dense<0xFF800000> : vector<1xf32>
    %39 = vector.multi_reduction <maximumf>, %38, %cst_19 [1] : vector<1x128xf32> to vector<1xf32>
    %40 = vector.shape_cast %39 : vector<1xf32> to vector<1x1xf32>
    %41 = vector.broadcast %40 : vector<1x1xf32> to vector<1x128xf32>
    %42 = arith.subf %38, %41 : vector<1x128xf32>
    %43 = math.exp %42 : vector<1x128xf32>
    %cst_20 = arith.constant dense<0.000000e+00> : vector<1xf32>
    %44 = vector.multi_reduction <add>, %43, %cst_20 [1] : vector<1x128xf32> to vector<1xf32>
    %45 = vector.shape_cast %44 : vector<1xf32> to vector<1x1xf32>
    %46 = tpu.reciprocal %45 {approx = true} : vector<1x1xf32> -> vector<1x1xf32>
    %47 = arith.mulf %45, %46 : vector<1x1xf32>
    %cst_21 = arith.constant 2.000000e+00 : f32
    %48 = vector.broadcast %cst_21 : f32 to vector<1x1xf32>
    %49 = arith.subf %48, %47 : vector<1x1xf32>
    %50 = arith.mulf %46, %49 : vector<1x1xf32>
    %51 = vector.broadcast %50 : vector<1x1xf32> to vector<1x128xf32>
    %52 = arith.mulf %43, %51 : vector<1x128xf32>
    %c0_22 = arith.constant 0 : index
    %c0_23 = arith.constant 0 : index
    %53 = vector.load %arg6[%c0_22, %c0_23] : memref<2x128xf32, #tpu.memory_space<vmem>>, vector<1x128xf32>
    tpu.vector_store %arg6[%c0_22, %c0_23], %52 {strides = array<i32>} : memref<2x128xf32, #tpu.memory_space<vmem>>, vector<1x128xf32>,
    %54 = vector.shape_cast %30 : vector<1x1xf32> to vector<1x1xf32>
    %55 = vector.broadcast %54 : vector<1x1xf32> to vector<1x128xf32>
    %c1_24 = arith.constant 1 : index
    %c0_25 = arith.constant 0 : index
    %56 = vector.load %arg6[%c1_24, %c0_25] : memref<2x128xf32, #tpu.memory_space<vmem>>, vector<1x128xf32>
    tpu.vector_store %arg6[%c1_24, %c0_25], %55 {strides = array<i32>} : memref<2x128xf32, #tpu.memory_space<vmem>>, vector<1x128xf32>,
    return
  }
}

</mosaic_0001>

<bundles_post_ra>
// kernel: tpu_custom_call.1
= control target key start
LH: loop header
LB: loop body
LE: loop exit
PB: predicated region body
PF: predicated region fallthrough
CT: control target
= control target key end

     0   :  { %s635_s0 = inlined_call_operand.vmem [shape: bf16[128,128], index: 0, kind: input, shape index: {}]   ;;  %s636_s1 = inlined_call_operand.vmem [shape: bf16[16,128], index: 1, kind: input, shape index: {}]   ;;  %s637_s2 = inlined_call_operand.vmem [shape: bf16[64,16], index: 2, kind: input, shape index: {}]   ;;  %s638_s3 = inlined_call_operand.vmem [shape: bf16[8,64], index: 3, kind: input, shape index: {}]   ;;  %s639_s4 = inlined_call_operand.vmem [shape: f32[64,2], index: 4, kind: input, shape index: {}]   ;;  %s640_s5 = inlined_call_operand.vmem [shape: f32[1,128], index: 5, kind: input, shape index: {}]   ;;  %s641_s6 = inlined_call_operand.hbm [shape: f32[2,128], index: 6, kind: output, shape index: {}]  }
   0x1   :  { %v465_v0 = vld [vmem:[%s635_s0 + $0x38] sm:$0xff]  ;;  %v464_v1 = vld [vmem:[%s635_s0 + $0x30] sm:$0xff] }
   0x2   :  { %97 = vmatpush.bf16.msra.mxu0 %v465_v0  ;;  %471 = vmatpush.bf16.msra.mxu2 %v465_v0 }
   0x3   :  { %11 = vsyncpa [#allocation3], 0  ;;  %v463_v2 = vld [vmem:[%s635_s0 + $0x28] sm:$0xff]  ;;  %v462_v3 = vld [vmem:[%s635_s0 + $0x20] sm:$0xff]  ;;  %v517_v9 = vmov 0   ;;  %vm188_vm0 = vcmask 130048   ;;  %v238_v29 = vlaneseq }
   0x4   :  { %v461_v4 = vld [vmem:[%s635_s0 + $0x18] sm:$0xff]  ;;  %v460_v5 = vld [vmem:[%s635_s0 + $0x10] sm:$0xff]  ;;  %v459_v6 = vld [vmem:[%s635_s0 + $0x8] sm:$0xff]  ;;  %483 = vset.pattern.permute.xlu0 %v517_v9  ;;  %484 = vset.pattern.permute.xlu1 %v517_v9  ;;  %v518_v38 = vmov 0.0   ;;  %s519_s14 = smov 127   ;;  %vm289_vm2 = vcmask 523264  }
   0x5   :  { %v458_v7 = vld [vmem:[%s635_s0] sm:$0xff]  ;;  %485 = vset.pattern.permute.xlu2 %v517_v9  ;;  %v122_v10 = vld [vmem:[%s639_s4 + $0x10] sm:$0xff]  ;;  %v123_v12 = vld [vmem:[%s639_s4 + $0x18] sm:$0xff]  ;;  %v619_v32 = vand.u32 127, %v238_v29  ;;  %vm361_vm4 = vcmask 1042434   ;;  %s390_s18 = sshll.u32 %s641_s6, 4  ;;  %s391_s18 = int_to_ptr.hbm [resolvable:$true] %s390_s18 }
   0x6   :  { %98 = vmatpush.bf16.msra.mxu0 %v464_v1  ;;  %472 = vmatpush.bf16.msra.mxu2 %v464_v1  ;;  %v466_v8 = vld [vmem:[%s636_s1] sm:$0xff]  ;;  %v125_v13 = vld [vmem:[%s639_s4 + $0x28] sm:$0xff]  ;;  %v126_v21 = vld [vmem:[%s639_s4 + $0x30] sm:$0xff] }
   0x7   :  { %140 = vperm.xlu0 %483, %v122_v10   ;;  %v124_v11 = vld [vmem:[%s639_s4 + $0x20] sm:$0xff]  ;;  %v121_v15 = vld [vmem:[%s639_s4 + $0x8] sm:$0xff]  ;;  %160 = vperm.xlu2 %485, %v126_v21   ;;  %v127_v22 = vld [vmem:[%s639_s4 + $0x38] sm:$0xff]  ;;  %vm240_vm1 = vcmp.lt.s32.totalorder %v619_v32, 8  ;;  %vm346_vm3 = vcmp.eq.s32.totalorder %v619_v32, 8 }
   0x8   :  { %150 = vperm.xlu1 %484, %v124_v11   ;;  %v120_v14 = vld [vmem:[%s639_s4] sm:$0xff]  ;;  %v468_v20 = vld [vmem:[%s637_s2 + $0x8] sm:$0xff]  ;;  %v469_v23 = vld [vmem:[%s637_s2 + $0x10] sm:$0xff]  ;;  %v455_v39 = vsel %vm240_vm1, 1.0, %v518_v38 }
   0x9   :  { %v467_v19 = vld [vmem:[%s637_s2] sm:$0xff]  ;;  %v470_v24 = vld [vmem:[%s637_s2 + $0x18] sm:$0xff] }
   0xa   :  { %99 = vmatpush.bf16.msra.mxu0 %v463_v2  ;;  %473 = vmatpush.bf16.msra.mxu2 %v463_v2  ;;  %v284_v29 = vld [vmem:[%s638_s3] sm:$0xf] }
   0xe   :  { %100 = vmatpush.bf16.msra.mxu0 %v462_v3  ;;  %474 = vmatpush.bf16.msra.mxu2 %v462_v3 }
   0xf   :  { %145 = vperm.xlu0 %483, %v123_v12   ;;  %165 = vperm.xlu2 %485, %v127_v22  }
  0x10   :  { %155 = vperm.xlu1 %484, %v125_v13  }
  0x12   :  { %101 = vmatpush.bf16.msra.mxu0 %v461_v4  ;;  %475 = vmatpush.bf16.msra.mxu2 %v461_v4 }
  0x16   :  { %102 = vmatpush.bf16.msra.mxu0 %v460_v5  ;;  %476 = vmatpush.bf16.msra.mxu2 %v460_v5 }
  0x17   :  { %130 = vperm.xlu0 %483, %v120_v14  }
  0x18   :  { %135 = vperm.xlu1 %484, %v121_v15  }
  0x1a   :  { %103 = vmatpush.bf16.msra.mxu0 %v459_v6  ;;  %477 = vmatpush.bf16.msra.mxu2 %v459_v6 }
  0x1e   :  { %104 = vmatpush.bf16.msra.mxu0 %v458_v7  ;;  %478 = vmatpush.bf16.msra.mxu2 %v458_v7 }
  0x21   :  { %105 = vmatmul.bf16.vlgmr.msra.gmra.mxu0 %v466_v8 }
  0x22   :  { %255 = vmatpush.bf16.msrb.mxu0 %v465_v0 }
  0x26   :  { %256 = vmatpush.bf16.msrb.mxu0 %v464_v1 }
  0x2a   :  { %257 = vmatpush.bf16.msrb.mxu0 %v463_v2 }
  0x2e   :  { %258 = vmatpush.bf16.msrb.mxu0 %v462_v3 }
  0x32   :  { %259 = vmatpush.bf16.msrb.mxu0 %v461_v4 }
  0x36   :  { %260 = vmatpush.bf16.msrb.mxu0 %v460_v5 }
  0x3a   :  { %261 = vmatpush.bf16.msrb.mxu0 %v459_v6 }
  0x3e   :  { %262 = vmatpush.bf16.msrb.mxu0 %v458_v7 }
  0x61   :  { %v161_v61 = vpop.permute.xlu2 %160 }
  0x69   :  { %v166_v3 = vpop.permute.xlu2 %165 }
  0x79   :  { %v141_v25 = vpop.permute.xlu0 %140 }
  0x7a   :  { %v151_v26 = vpop.permute.xlu1 %150 }
  0x81   :  { %v146_v27 = vpop.permute.xlu0 %145 }
  0x82   :  { %v156_v28 = vpop.permute.xlu1 %155 }
  0x89   :  { %v131_v31 = vpop.permute.xlu0 %130 }
  0x8a   :  { %v136_v34 = vpop.permute.xlu1 %135 }
  0x9e   :  { %v106_v16 = vpop.f32.mrf.mxu0 }
  0xa6   :  { %v108_v17 = vpop.f32.mrf.mxu0 }
  0xa7   :  { %v119_v18 = vpack.c.bf16 %v108_v17, %v106_v16 }
  0xa9   :  { %208 = vmatpush.bf16.msra.mxu1 %v119_v18  ;;  %v339_v18 = vld [vmem:[%s639_s4] sm:$0x1] }
  0xac   :  { %451 = vmatmul.msk.bf16.vlgmr.msra.gmra.mxu1 %vm188_vm0, %v467_v19 }
  0xbc   :  { %452 = vmatmul.msk.bf16.gmra.mxu1 %vm188_vm0, %v468_v20  ;;  %v341_v20 = vrot.slane %v339_v18, 7 }
  0xcc   :  { %453 = vmatmul.msk.bf16.gmra.mxu1 %vm188_vm0, %v469_v23 }
  0xdc   :  { %454 = vmatmul.msk.bf16.gmra.mxu1 %vm188_vm0, %v470_v24 }
 0x129   :  { %v210_v30 = vpop.f32.mrf.mxu1 }
 0x12a   :  { %v211_v33 = vadd.f32 %v210_v30, %v131_v31 }
 0x12c   :  { %v230_v36 = vmax.f32 %v211_v33, 0.0 }
 0x12e   :  { %v243_v41 = vmul.f32 %v455_v39, %v230_v36 }
 0x131   :  { %v212_v35 = vpop.f32.mrf.mxu1 }
 0x132   :  { %v213_v37 = vadd.f32 %v212_v35, %v136_v34 }
 0x134   :  { %v231_v40 = vmax.f32 %v213_v37, 0.0 }
 0x136   :  { %v244_v42 = vmul.f32 %v455_v39, %v231_v40 }
 0x138   :  { %v251_v43 = vpack.c.bf16 %v244_v42, %v243_v41 }
 0x139   :  { %v215_v44 = vpop.f32.mrf.mxu1 }
 0x13a   :  { %263 = vmatmul.bf16.vlgmr.msrb.gmra.mxu0 %v251_v43  ;;  %v216_v45 = vadd.f32 %v215_v44, %v141_v25 }
 0x13c   :  { %v232_v47 = vmax.f32 %v216_v45, 0.0 }
 0x13e   :  { %v245_v50 = vmul.f32 %v455_v39, %v232_v47 }
 0x141   :  { %v217_v46 = vpop.f32.mrf.mxu1 }
 0x142   :  { %v218_v48 = vadd.f32 %v217_v46, %v146_v27 }
 0x144   :  { %v233_v49 = vmax.f32 %v218_v48, 0.0 }
 0x146   :  { %v246_v51 = vmul.f32 %v455_v39, %v233_v49 }
 0x148   :  { %v252_v52 = vpack.c.bf16 %v246_v51, %v245_v50 }
 0x149   :  { %v220_v53 = vpop.f32.mrf.mxu1 }
 0x14a   :  { %v221_v54 = vadd.f32 %v220_v53, %v151_v26  ;;  %268 = vmatmul.bf16.vlgmr.msra.gmra.mxu2 %v252_v52 }
 0x14c   :  { %v234_v55 = vmax.f32 %v221_v54, 0.0 }
 0x14e   :  { %v247_v56 = vmul.f32 %v455_v39, %v234_v55 }
 0x150   :  { %314 = vmax.xlane.f32.xlu1 %v247_v56 }
 0x151   :  { %v222_v57 = vpop.f32.mrf.mxu1 }
 0x152   :  { %v223_v58 = vadd.f32 %v222_v57, %v156_v28 }
 0x154   :  { %v235_v59 = vmax.f32 %v223_v58, 0.0 }
 0x156   :  { %v248_v60 = vmul.f32 %v455_v39, %v235_v59 }
 0x158   :  { %316 = vmax.xlane.f32.xlu2 %v248_v60  ;;  %306 = vmax.xlane.f32.xlu1 %v243_v41  ;;  %v253_v62 = vpack.c.bf16 %v248_v60, %v247_v56  ;;  %v486_v41 = vld [vmem:[%s640_s5] ss:$0 sm:$0xff]  ;;  %s520_s5 = smov [#allocation2]  }
 0x159   :  { %v225_v63 = vpop.f32.mrf.mxu1  ;;  %s388_s1 = sshll.u32 %s520_s5, 4  ;;  %s389_s1 = int_to_ptr.vmem [resolvable:$true] %s388_s1 }
 0x15a   :  { %v226_v0 = vadd.f32 %v225_v63, %v161_v61  ;;  %273 = vmatmul.bf16.gmra.mxu2 %v253_v62 }
 0x15c   :  { %v236_v1 = vmax.f32 %v226_v0, 0.0 }
 0x15e   :  { %v249_v2 = vmul.f32 %v455_v39, %v236_v1 }
 0x160   :  { %318 = vmax.xlane.f32.xlu2 %v249_v2 }
 0x161   :  { %v227_v4 = vpop.f32.mrf.mxu1 }
 0x162   :  { %v228_v5 = vadd.f32 %v227_v4, %v166_v3 }
 0x164   :  { %v237_v6 = vmax.f32 %v228_v5, 0.0 }
 0x166   :  { %v250_v7 = vmul.f32 %v455_v39, %v237_v6 }
 0x168   :  { %320 = vmax.xlane.f32.xlu0 %v250_v7  ;;  %310 = vmax.xlane.f32.xlu2 %v245_v50  ;;  %v254_v8 = vpack.c.bf16 %v250_v7, %v249_v2 }
 0x16a   :  { %278 = vmatmul.bf16.gmra.mxu2 %v254_v8 }
 0x170   :  { %312 = vmax.xlane.f32.xlu0 %v246_v51  ;;  %308 = vmax.xlane.f32.xlu2 %v244_v42 }
 0x188   :  { %342 = vrot.lane.b32.xlu2 %v341_v20, %s519_s14 }
 0x1b7   :  { %v264_v15 = vpop.f32.mrf.mxu0 }
 0x1bf   :  { %v266_v24 = vpop.f32.mrf.mxu0 }
 0x1c0   :  { %v285_v25 = vpack.c.bf16 %v266_v24, %v264_v15 }
 0x1c3   :  { %v315_v28 = vpop.xlane.xlu1 %314 }
 0x1cb   :  { %v317_v14 = vpop.xlane.xlu2 %316  ;;  %v307_v35 = vpop.xlane.xlu1 %306 }
 0x1cc   :  { %v324_v30 = vpack.c.bf16 %v317_v14, %v315_v28 }
 0x1cd   :  { %v269_v9 = vpop.f32.mrf.mxu2 }
 0x1d3   :  { %v319_v19 = vpop.xlane.xlu2 %318 }
 0x1d5   :  { %v271_v10 = vpop.f32.mrf.mxu2 }
 0x1d6   :  { %v286_v22 = vpack.c.bf16 %v271_v10, %v269_v9 }
 0x1db   :  { %v321_v23 = vpop.xlane.xlu0 %320  ;;  %v311_v26 = vpop.xlane.xlu2 %310 }
 0x1dc   :  { %v325_v27 = vpack.c.bf16 %v321_v23, %v319_v19 }
 0x1dd   :  { %v274_v11 = vpop.f32.mrf.mxu2 }
 0x1e3   :  { %v313_v31 = vpop.xlane.xlu0 %312  ;;  %v309_v34 = vpop.xlane.xlu2 %308 }
 0x1e4   :  { %v323_v33 = vpack.c.bf16 %v313_v31, %v311_v26  ;;  %v322_v36 = vpack.c.bf16 %v309_v34, %v307_v35 }
 0x1e5   :  { %v276_v12 = vpop.f32.mrf.mxu2 }
 0x1e6   :  { %v287_v21 = vpack.c.bf16 %v276_v12, %v274_v11 }
 0x1eb   :  { %v343_v52 = vpop.permute.xlu2 %342 }
 0x1ed   :  { %v279_v13 = vpop.f32.mrf.mxu2 }
 0x1f5   :  { %v281_v16 = vpop.f32.mrf.mxu2 }
 0x1f6   :  { %v288_v17 = vpack.c.bf16 %v281_v16, %v279_v13 }
 0x1f8   :  { %297 = vmatpush.bf16.msra.mxu3 %v288_v17 }
 0x1fc   :  { %298 = vmatpush.bf16.msra.mxu3 %v287_v21 }
 0x200   :  { %299 = vmatpush.bf16.msra.mxu3 %v286_v22 }
 0x204   :  { %300 = vmatpush.bf16.msra.mxu3 %v285_v25 }
 0x207   :  { %456 = vmatmul.msk.bf16.vlgmr.msra.gmra.mxu3 %vm289_vm2, %v284_v29 }
 0x208   :  { %330 = vmatpush.bf16.msrb.mxu3 %v325_v27 }
 0x20c   :  { %331 = vmatpush.bf16.msrb.mxu3 %v324_v30 }
 0x210   :  { %332 = vmatpush.bf16.msrb.mxu3 %v323_v33 }
 0x214   :  { %333 = vmatpush.bf16.msrb.mxu3 %v322_v36 }
 0x217   :  { %457 = vmatmul.msk.bf16.vlgmr.msrb.gmra.mxu3 %vm289_vm2, %v284_v29 }
 0x28a   :  { %v302_v37 = vpop.f32.mrf.mxu3 }
 0x28b   :  { %v353_v42 = vrot.slane %v302_v37, 6 }
 0x292   :  { %v304_v38 = vpop.f32.mrf.mxu3 }
 0x29a   :  { %v335_v39 = vpop.f32.mrf.mxu3 }
 0x29b   :  { %349 = vperm.xlu0 %483, %v335_v39   ;;  %v345_v32 = vadd.f32 %v343_v52, %v335_v39 }
 0x2a2   :  { %v337_v40 = vpop.f32.mrf.mxu3 }
 0x30d   :  { %v350_v43 = vpop.permute.xlu0 %349 }
 0x30e   :  { %v355_v44 = vsel %vm346_vm3, %v350_v43, %v353_v42 }
 0x30f   :  { %v360_v45 = vadd.f32 %v486_v41, %v355_v44 }
 0x311   :  { %v362_v46 = vsel %vm361_vm4, %v360_v45, -inf }
 0x312   :  { %363 = vmax.xlane.f32.xlu1 %v362_v46 }
 0x385   :  { %v364_v47 = vpop.xlane.xlu1 %363 }
 0x386   :  { %v365_v48 = vsub.f32 %v360_v45, %v364_v47 }
 0x388   :  { %v366_v49 = vmul.f32 1.442695, %v365_v48 }
 0x38a   :  { %487 = vpow2.f32 %v366_v49 }
 0x390   :  { %v488_v50 = vpop.eup %487 }
 0x391   :  { %v368_v51 = vsel %vm361_vm4, %v488_v50, 0.0 }
 0x392   :  { %369 = vadd.xlane.f32.xlu1 %v368_v51 }
 0x3ab   :  { %379 = vperm.xlu1 %484, %v345_v32  }
 0x405   :  { %v370_v53 = vpop.xlane.xlu1 %369 }
 0x406   :  { %489 = vrcp.f32 %v370_v53 }
 0x40c   :  { %v490_v54 = vpop.eup %489 }
 0x40d   :  { %v372_v55 = vmul.f32 %v490_v54, %v370_v53 }
 0x40f   :  { %v373_v56 = vsub.f32 2.0, %v372_v55 }
 0x411   :  { %v374_v57 = vmul.f32 %v490_v54, %v373_v56 }
 0x413   :  { %v375_v58 = vmul.f32 %v488_v50, %v374_v57 }
 0x415   :  { %376 = vst [vmem:[#allocation2 - $0x2] sm:$0x4] %v375_v58 }
 0x41d   :  { %v380_v59 = vpop.permute.xlu1 %379 }
 0x41e   :  { %382 = vst [vmem:[#allocation2] sm:$0x2] %v380_v59 }
 0x41f   :  { %393 = dma.vmem_to_hbm [thread:$0]  %s389_s1, 32, %s391_s18, [#allocation3]  }
 0x420   :  { %515 = dma.done.wait [#allocation3], 32  }
 0x421   :  { %516 = vsyncadd [#allocation3], 4294967264 }
 0x422   :  { %398 = vsyncpa [#allocation3], 1 }

</bundles_post_ra>
